<compile_context>
chip_gen: v7x
topology: tpu7x:2x2x1
jax: 0.10.0
libtpu: 0.0.40
codegen_flags: <defaults>
</compile_context>

<pallas_src>
import jax
import jax.numpy as jnp
import numpy as np
from jax.experimental import pallas as pl
from jax.experimental.pallas import tpu as pltpu

EPS = 1e-5  # InstanceNorm3d default eps


def _upconv_kernel(x_ref, wk_ref, a_ref, g_ref, b_ref, mdk_ref, mhw_ref, o_ref):
    # x_ref  : (Bt*Cin*D,   H*W)        input block, rows = (b, cin, d)
    # wk_ref : (Bt*Cout*D,  Bt*Cin*D)   I_Bt (x) conv_w (x) I_D   (1x1x1 conv)
    # a_ref  : (Bt*Cout*D,  Bt*Cout*D)  per-(b,c) group-average matrix, 1/(D*H*W) folded in
    # g_ref  : (Bt*Cout*D, 1)           instance-norm gamma per row
    # b_ref  : (Bt*Cout*D, 1)           instance-norm beta per row
    # mdk_ref: (Bt*Cout*2D, Bt*Cout*D)  I_(Bt*Cout) (x) Md  (depth upsample), bf16
    # mhw_ref: (H*W, 4*H*W)             kron(Mh, Mw)^T (H,W upsample), bf16
    # o_ref  : (Bt*Cout*2D, 4*H*W)      output block, rows = (b, c, d'), lanes = (h', w')
    x = x_ref[...]
    wk = wk_ref[...]
    a = a_ref[...]

    # 1x1x1 conv == row-side matmul (rows carry (b, c, d))
    y = jnp.dot(wk, x, preferred_element_type=jnp.float32)

    # InstanceNorm3d: biased stats per (b, c) over (d, h, w).
    # A reduces over the d-rows of each (b, c) group and broadcasts back;
    # the lane reduction finishes the spatial mean.
    mean = jnp.sum(jnp.dot(a, y, preferred_element_type=jnp.float32),
                   axis=-1, keepdims=True)
    yc = y - mean
    var = jnp.sum(jnp.dot(a, yc * yc, preferred_element_type=jnp.float32),
                  axis=-1, keepdims=True)
    yn = yc * jax.lax.rsqrt(var + EPS) * g_ref[...] + b_ref[...]

    # ReLU
    yn = jnp.maximum(yn, 0.0)

    # depth upsample: rows (b,c,d) -> (b,c,d'), bf16 MXU, f32 accumulate
    z = jnp.dot(mdk_ref[...], yn.astype(jnp.bfloat16),
                preferred_element_type=jnp.float32)

    # H,W upsample: lanes (h,w) -> (h',w'), bf16 MXU, f32 accumulate
    o_ref[...] = jnp.dot(z.astype(jnp.bfloat16), mhw_ref[...],
                         preferred_element_type=jnp.float32)


def _linear_upsample_matrix(size, scale=2):
    """(scale*size, size) matrix for 1-D linear upsample, align_corners=False
    (PyTorch half-pixel convention, src clamped at 0)."""
    out = size * scale
    j = jnp.arange(out, dtype=jnp.float32)
    src = jnp.maximum((j + 0.5) / scale - 0.5, 0.0)
    i0 = jnp.minimum(jnp.floor(src).astype(jnp.int32), size - 1)
    i1 = jnp.minimum(i0 + 1, size - 1)
    lam = src - i0.astype(jnp.float32)
    m = jnp.zeros((out, size), jnp.float32)
    m = m.at[jnp.arange(out), i0].add(1.0 - lam)
    m = m.at[jnp.arange(out), i1].add(lam)
    return m


def upconv(x, w, gamma, beta, scale=2, batch_block=None):
    """x: (N, Cin, D, H, W) f32.  Returns (N, Cout, scale*D, scale*H, scale*W)."""
    N, Cin, D, H, W = x.shape
    Cout = w.shape[0]
    HW = H * W
    Dp, Hp, Wp = scale * D, scale * H, scale * W
    HWp = Hp * Wp

    # Pack a few batch elements per grid step only while MXU rows (Cout * 2D)
    # are under-occupied; at realistic sizes depth alone fills the M dimension.
    if batch_block is None:
        target = max(1, 128 // max(1, Cout * Dp))
        batch_block = 1
        for cand in range(min(N, target), 0, -1):
            if N % cand == 0:
                batch_block = cand
                break
    Bt = batch_block
    assert N % Bt == 0
    G = N // Bt

    R_in = Bt * Cin * D
    R_mid = Bt * Cout * D
    R_out = Bt * Cout * Dp

    f32 = jnp.float32
    # separable trilinear interpolation factors (entries exact in bf16)
    Md = _linear_upsample_matrix(D, scale)                                  # (2D, D)
    Mh = _linear_upsample_matrix(H, scale)
    Mw = _linear_upsample_matrix(W, scale)
    MhwT = jnp.kron(Mh, Mw).T.astype(jnp.bfloat16)                          # (HW, 4HW)
    Mdk = jnp.kron(jnp.eye(Bt * Cout, dtype=f32), Md).astype(jnp.bfloat16)  # (R_out, R_mid)

    # block-diagonal 1x1x1 conv weight: rows (b, c, d) <- cols (b, cin, d)
    Wk = jnp.kron(jnp.eye(Bt, dtype=f32),
                  jnp.kron(w.astype(f32), jnp.eye(D, dtype=f32)))           # (R_mid, R_in)
    # per-(b, c) group averaging (reduce over d, broadcast back), 1/(D*HW) folded in
    A = jnp.kron(jnp.eye(Bt * Cout, dtype=f32),
                 jnp.full((D, D), 1.0 / (D * HW), dtype=f32))               # (R_mid, R_mid)

    g_rows = jnp.tile(jnp.repeat(gamma.astype(f32), D), Bt).reshape(R_mid, 1)
    b_rows = jnp.tile(jnp.repeat(beta.astype(f32), D), Bt).reshape(R_mid, 1)

    x2 = x.astype(f32).reshape(N * Cin * D, HW)

    # explicit VMEM budget: double-buffered pipelined blocks + resident constants + temps
    vmem_bytes = 2 * 4 * (R_in * HW + R_out * HWp)
    vmem_bytes += 2 * (4 * (R_mid * R_in + R_mid * R_mid + 2 * R_mid)
                       + 2 * (R_out * R_mid + HW * HWp))
    vmem_bytes += 4 * (6 * R_mid * HW + 2 * R_out * HW + R_out * HWp)
    vmem_limit = int(min(64 * 1024 * 1024, max(32 * 1024 * 1024, 2 * vmem_bytes)))

    flops_per_step = 2 * (R_mid * R_in * HW            # conv
                          + 2 * R_mid * R_mid * HW     # norm statistics
                          + R_out * R_mid * HW         # depth upsample
                          + R_out * HW * HWp)          # H,W upsample
    cost = pl.CostEstimate(
        flops=int(G * flops_per_step),
        transcendentals=int(G * R_mid),
        bytes_accessed=int(x2.size * 4 + N * Cout * Dp * HWp * 4
                           + G * (Wk.size * 4 + A.size * 4 + Mdk.size * 2 + MhwT.size * 2)),
    )

    out = pl.pallas_call(
        _upconv_kernel,
        out_shape=jax.ShapeDtypeStruct((N * Cout * Dp, HWp), jnp.float32),
        grid=(G,),
        in_specs=[
            pl.BlockSpec((R_in, HW), lambda g: (g, 0)),        # x block
            pl.BlockSpec((R_mid, R_in), lambda g: (0, 0)),     # conv weight (grid-invariant)
            pl.BlockSpec((R_mid, R_mid), lambda g: (0, 0)),    # group-average matrix
            pl.BlockSpec((R_mid, 1), lambda g: (0, 0)),        # gamma
            pl.BlockSpec((R_mid, 1), lambda g: (0, 0)),        # beta
            pl.BlockSpec((R_out, R_mid), lambda g: (0, 0)),    # depth interp (bf16)
            pl.BlockSpec((HW, HWp), lambda g: (0, 0)),         # H,W interp (bf16)
        ],
        out_specs=pl.BlockSpec((R_out, HWp), lambda g: (g, 0)),
        compiler_params=pltpu.CompilerParams(
            dimension_semantics=("parallel",),
            vmem_limit_bytes=vmem_limit,
        ),
        cost_estimate=cost,
    )(x2, Wk, A, g_rows, b_rows, Mdk, MhwT)

    return out.reshape(N, Cout, Dp, Hp, Wp)


def upconv_ref(x, w, gamma, beta, scale=2):
    """Pure-JAX reference (separable interpolation) for sanity checking."""
    y = jnp.einsum('oc,ncdhw->nodhw', w, x)
    mean = y.mean(axis=(2, 3, 4), keepdims=True)
    var = jnp.square(y - mean).mean(axis=(2, 3, 4), keepdims=True)
    y = (y - mean) / jnp.sqrt(var + EPS)
    y = y * gamma[None, :, None, None, None] + beta[None, :, None, None, None]
    y = jnp.maximum(y, 0.0)
    D, H, W = x.shape[2:]
    Md = _linear_upsample_matrix(D, scale)
    Mh = _linear_upsample_matrix(H, scale)
    Mw = _linear_upsample_matrix(W, scale)
    y = jnp.einsum('Dd,ncdhw->ncDhw', Md, y)
    y = jnp.einsum('Hh,ncdhw->ncdHw', Mh, y)
    y = jnp.einsum('Ww,ncdhw->ncdhW', Mw, y)
    return y


if __name__ == "__main__":
    key = jax.random.PRNGKey(0)
    k1, k2, k3, k4 = jax.random.split(key, 4)

    N, Cin, Cout, D, H, W = 4, 4, 8, 4, 8, 8

    x = jax.random.normal(k1, (N, Cin, D, H, W), dtype=jnp.float32)
    # Conv3d(Cin, Cout, kernel_size=1, bias=False) weight -> (Cout, Cin) (1x1x1 squeezed)
    w = jax.random.normal(k2, (Cout, Cin), dtype=jnp.float32) * jnp.sqrt(2.0 / Cin)
    # InstanceNorm3d affine params (perturbed from 1/0 defaults so the path is exercised)
    gamma = 1.0 + 0.1 * jax.random.normal(k3, (Cout,), dtype=jnp.float32)
    beta = 0.1 * jax.random.normal(k4, (Cout,), dtype=jnp.float32)

    out = jax.block_until_ready(upconv(x, w, gamma, beta, scale=2))
    ref = jax.block_until_ready(upconv_ref(x, w, gamma, beta, scale=2))

    assert out.shape == (N, Cout, 2 * D, 2 * H, 2 * W), out.shape
    np.testing.assert_allclose(np.asarray(out), np.asarray(ref), rtol=2e-2, atol=2e-2)
    print("KERNEL_OK")
</pallas_src>

<mosaic_0001>
module attributes {stable_mosaic.version = 11 : i64} {
  func.func @_upconv_kernel(%arg0: i32, %arg1: memref<32x64xf32, #tpu.memory_space<vmem>>, %arg2: memref<64x32xf32, #tpu.memory_space<vmem>>, %arg3: memref<64x64xf32, #tpu.memory_space<vmem>>, %arg4: memref<64x1xf32, #tpu.memory_space<vmem>>, %arg5: memref<64x1xf32, #tpu.memory_space<vmem>>, %arg6: memref<128x64xbf16, #tpu.memory_space<vmem>>, %arg7: memref<64x256xbf16, #tpu.memory_space<vmem>>, %arg8: memref<128x256xf32, #tpu.memory_space<vmem>>) attributes {dimension_semantics = [#tpu.dimension_semantics<parallel>], iteration_bounds = array<i64: 2>, scalar_prefetch = 0 : i64, scratch_operands = 0 : i64, tpu.core_type = #tpu.core_type<tc>, window_params = [{transform_indices = @transform_0, window_bounds = array<i64: 32, 64>}, {pipeline_mode = #tpu.pipeline_mode<synchronous>, transform_indices = @transform_1, window_bounds = array<i64: 64, 32>}, {pipeline_mode = #tpu.pipeline_mode<synchronous>, transform_indices = @transform_2, window_bounds = array<i64: 64, 64>}, {pipeline_mode = #tpu.pipeline_mode<synchronous>, transform_indices = @transform_3, window_bounds = array<i64: 64, 1>}, {pipeline_mode = #tpu.pipeline_mode<synchronous>, transform_indices = @transform_4, window_bounds = array<i64: 64, 1>}, {pipeline_mode = #tpu.pipeline_mode<synchronous>, transform_indices = @transform_5, window_bounds = array<i64: 128, 64>}, {pipeline_mode = #tpu.pipeline_mode<synchronous>, transform_indices = @transform_6, window_bounds = array<i64: 64, 256>}, {transform_indices = @transform_7, window_bounds = array<i64: 128, 256>}]} {
    %c0 = arith.constant 0 : index
    %c0_0 = arith.constant 0 : index
    %0 = vector.load %arg1[%c0, %c0_0] : memref<32x64xf32, #tpu.memory_space<vmem>>, vector<32x64xf32>
    %c0_1 = arith.constant 0 : index
    %c0_2 = arith.constant 0 : index
    %1 = vector.load %arg2[%c0_1, %c0_2] : memref<64x32xf32, #tpu.memory_space<vmem>>, vector<64x32xf32>
    %c0_3 = arith.constant 0 : index
    %c0_4 = arith.constant 0 : index
    %2 = vector.load %arg3[%c0_3, %c0_4] : memref<64x64xf32, #tpu.memory_space<vmem>>, vector<64x64xf32>
    %cst = arith.constant dense<0.000000e+00> : vector<64x64xf32>
    %3 = tpu.matmul %1, %0, %cst {dimension_numbers = #tpu.dot_dimension_numbers<[1], [0], [0], [1], [0, 0, 1, 1], [], []>} : vector<64x32xf32>, vector<32x64xf32>, vector<64x64xf32> -> vector<64x64xf32>
    %cst_5 = arith.constant dense<0.000000e+00> : vector<64x64xf32>
    %4 = tpu.matmul %2, %3, %cst_5 {dimension_numbers = #tpu.dot_dimension_numbers<[1], [0], [0], [1], [0, 0, 1, 1], [], []>} : vector<64x64xf32>, vector<64x64xf32>, vector<64x64xf32> -> vector<64x64xf32>
    %cst_6 = arith.constant dense<0.000000e+00> : vector<64xf32>
    %5 = vector.multi_reduction <add>, %4, %cst_6 [1] : vector<64x64xf32> to vector<64xf32>
    %6 = vector.shape_cast %5 : vector<64xf32> to vector<64x1xf32>
    %7 = vector.broadcast %6 : vector<64x1xf32> to vector<64x64xf32>
    %8 = arith.subf %3, %7 : vector<64x64xf32>
    %9 = arith.mulf %8, %8 : vector<64x64xf32>
    %cst_7 = arith.constant dense<0.000000e+00> : vector<64x64xf32>
    %10 = tpu.matmul %2, %9, %cst_7 {dimension_numbers = #tpu.dot_dimension_numbers<[1], [0], [0], [1], [0, 0, 1, 1], [], []>} : vector<64x64xf32>, vector<64x64xf32>, vector<64x64xf32> -> vector<64x64xf32>
    %cst_8 = arith.constant dense<0.000000e+00> : vector<64xf32>
    %11 = vector.multi_reduction <add>, %10, %cst_8 [1] : vector<64x64xf32> to vector<64xf32>
    %12 = vector.shape_cast %11 : vector<64xf32> to vector<64x1xf32>
    %cst_9 = arith.constant 9.99999974E-6 : f32
    %13 = vector.broadcast %cst_9 : f32 to vector<64x1xf32>
    %14 = arith.addf %12, %13 : vector<64x1xf32>
    %15 = math.rsqrt %14 : vector<64x1xf32>
    %16 = vector.broadcast %15 : vector<64x1xf32> to vector<64x64xf32>
    %17 = arith.mulf %8, %16 : vector<64x64xf32>
    %c0_10 = arith.constant 0 : index
    %c0_11 = arith.constant 0 : index
    %18 = vector.load %arg4[%c0_10, %c0_11] : memref<64x1xf32, #tpu.memory_space<vmem>>, vector<64x1xf32>
    %19 = vector.broadcast %18 : vector<64x1xf32> to vector<64x64xf32>
    %20 = arith.mulf %17, %19 : vector<64x64xf32>
    %c0_12 = arith.constant 0 : index
    %c0_13 = arith.constant 0 : index
    %21 = vector.load %arg5[%c0_12, %c0_13] : memref<64x1xf32, #tpu.memory_space<vmem>>, vector<64x1xf32>
    %22 = vector.broadcast %21 : vector<64x1xf32> to vector<64x64xf32>
    %23 = arith.addf %20, %22 : vector<64x64xf32>
    %cst_14 = arith.constant 0.000000e+00 : f32
    %24 = vector.broadcast %cst_14 : f32 to vector<64x64xf32>
    %25 = arith.maximumf %23, %24 : vector<64x64xf32>
    %c0_15 = arith.constant 0 : index
    %c0_16 = arith.constant 0 : index
    %26 = vector.load %arg6[%c0_15, %c0_16] : memref<128x64xbf16, #tpu.memory_space<vmem>>, vector<128x64xbf16>
    %27 = arith.truncf %25 : vector<64x64xf32> to vector<64x64xbf16>
    %cst_17 = arith.constant dense<0.000000e+00> : vector<128x64xf32>
    %28 = tpu.matmul %26, %27, %cst_17 {dimension_numbers = #tpu.dot_dimension_numbers<[1], [0], [0], [1], [0, 0, 1, 1], [], []>} : vector<128x64xbf16>, vector<64x64xbf16>, vector<128x64xf32> -> vector<128x64xf32>
    %29 = arith.truncf %28 : vector<128x64xf32> to vector<128x64xbf16>
    %c0_18 = arith.constant 0 : index
    %c0_19 = arith.constant 0 : index
    %30 = vector.load %arg7[%c0_18, %c0_19] : memref<64x256xbf16, #tpu.memory_space<vmem>>, vector<64x256xbf16>
    %cst_20 = arith.constant dense<0.000000e+00> : vector<128x256xf32>
    %31 = tpu.matmul %29, %30, %cst_20 {dimension_numbers = #tpu.dot_dimension_numbers<[1], [0], [0], [1], [0, 0, 1, 1], [], []>} : vector<128x64xbf16>, vector<64x256xbf16>, vector<128x256xf32> -> vector<128x256xf32>
    %c0_21 = arith.constant 0 : index
    %c0_22 = arith.constant 0 : index
    %32 = vector.load %arg8[%c0_21, %c0_22] : memref<128x256xf32, #tpu.memory_space<vmem>>, vector<128x256xf32>
    tpu.vector_store %arg8[%c0_21, %c0_22], %31 {strides = array<i32>} : memref<128x256xf32, #tpu.memory_space<vmem>>, vector<128x256xf32>,
    return
  }
  func.func @transform_0(%arg0: i32) -> (i32, i32) {
    %c0_i32 = arith.constant 0 : i32
    %c0_i32_0 = arith.constant 0 : i32
    return %arg0, %c0_i32 : i32, i32
  }
  func.func @transform_1(%arg0: i32) -> (i32, i32) {
    %c0_i32 = arith.constant 0 : i32
    %c0_i32_0 = arith.constant 0 : i32
    %c0_i32_1 = arith.constant 0 : i32
    return %c0_i32, %c0_i32_0 : i32, i32
  }
  func.func @transform_2(%arg0: i32) -> (i32, i32) {
    %c0_i32 = arith.constant 0 : i32
    %c0_i32_0 = arith.constant 0 : i32
    %c0_i32_1 = arith.constant 0 : i32
    return %c0_i32, %c0_i32_0 : i32, i32
  }
  func.func @transform_3(%arg0: i32) -> (i32, i32) {
    %c0_i32 = arith.constant 0 : i32
    %c0_i32_0 = arith.constant 0 : i32
    %c0_i32_1 = arith.constant 0 : i32
    return %c0_i32, %c0_i32_0 : i32, i32
  }
  func.func @transform_4(%arg0: i32) -> (i32, i32) {
    %c0_i32 = arith.constant 0 : i32
    %c0_i32_0 = arith.constant 0 : i32
    %c0_i32_1 = arith.constant 0 : i32
    return %c0_i32, %c0_i32_0 : i32, i32
  }
  func.func @transform_5(%arg0: i32) -> (i32, i32) {
    %c0_i32 = arith.constant 0 : i32
    %c0_i32_0 = arith.constant 0 : i32
    %c0_i32_1 = arith.constant 0 : i32
    return %c0_i32, %c0_i32_0 : i32, i32
  }
  func.func @transform_6(%arg0: i32) -> (i32, i32) {
    %c0_i32 = arith.constant 0 : i32
    %c0_i32_0 = arith.constant 0 : i32
    %c0_i32_1 = arith.constant 0 : i32
    return %c0_i32, %c0_i32_0 : i32, i32
  }
  func.func @transform_7(%arg0: i32) -> (i32, i32) {
    %c0_i32 = arith.constant 0 : i32
    %c0_i32_0 = arith.constant 0 : i32
    return %arg0, %c0_i32 : i32, i32
  }
}

</mosaic_0001>

<bundles_post_ra>
// kernel: tpu_custom_call.1
= control target key start
LH: loop header
LB: loop body
LE: loop exit
PB: predicated region body
PF: predicated region fallthrough
CT: control target
= control target key end

     0   :  { %12 = vsyncpa [#allocation3], 0  ;;  %s2269_s0 = inlined_call_operand.vmem [shape: f32[64,64], index: 0, kind: input, shape index: {}]   ;;  %s2270_s1 = inlined_call_operand.vmem [shape: f32[64,32], index: 1, kind: input, shape index: {}]   ;;  %s2271_s2 = inlined_call_operand.vmem [shape: f32[64,64], index: 2, kind: input, shape index: {}]   ;;  %s2272_s3 = inlined_call_operand.vmem [shape: f32[64,1], index: 3, kind: input, shape index: {}]   ;;  %s2273_s4 = inlined_call_operand.vmem [shape: f32[64,1], index: 4, kind: input, shape index: {}]   ;;  %s2274_s5 = inlined_call_operand.vmem [shape: bf16[128,64], index: 5, kind: input, shape index: {}]   ;;  %s2275_s6 = inlined_call_operand.vmem [shape: bf16[64,256], index: 6, kind: input, shape index: {}]   ;;  %s2276_s7 = inlined_call_operand.hbm [shape: f32[256,256], index: 7, kind: output, shape index: {}]  }
   0x1   :  { %14 = vsyncpa [#allocation3 + $0x1], 0  ;;  %s1812_s24 = smov 0   ;;  %s1814_s25 = smov 0  }
   0x2   :  { %s1816_s26 = smov 0   ;;  %s1818_s27 = smov 0  }
   0x3 LB: > { %s1833_s28 = sadd.s32 4294967295, %s1766_s27   ;;  %s1357_s29 = sadd.s32 4294967294, %s1766_s27   ;;  %s1766_s27 = sphi %s1818_s27, %s2282_s27   ;;  %s1762_s26 = sphi %s1816_s26, %s2281_s26   ;;  %s1758_s25 = sphi %s1814_s25, %s2280_s25   ;;  %s1754_s24 = sphi %s1812_s24, %s2279_s24  }
   0x4   : > { %s1837_s30 = sadd.s32 1, %s1766_s27   ;;  %s179_s8 = sadd.s32 1, %s1762_s26 }
   0x5   : > { %s176_s9 = ssub.s32 %s1766_s27, %s1837_s30  ;;  %p189_p0 = scmp.ne.s32.totalorder %s1762_s26, %s1758_s25 }
   0x6   : > { %p177_p1 = scmp.eq.s32.totalorder %s176_s9, 0  ;;  %p190_p2 = scmp.eq.s32.totalorder %s1833_s28, 1 }
   0x7   : > { %p195_p3 = scmp.ne.s32.totalorder %s1758_s25, %s1754_s24  ;;  %p196_p4 = scmp.eq.s32.totalorder %s1357_s29, 1 }
   0x8   : > { %s1848_s10 = scalar_select %p177_p1, %s1762_s26, %s179_s8  }
   0x9   : > { %p1850_p5 = por %p190_p2, %p189_p0  ;;  %p1854_p6 = por %p196_p4, %p195_p3 }
   0xa   : > { %p1360_p7 = scmp.ge.s32.totalorder %s1766_s27, 1  ;;  %p241_p8 = scmp.lt.s32.totalorder %s1766_s27, 3 }
   0xc   : > { %p242_p9 = pnand %p1360_p7, %p241_p8 }
   0xd   : > { %s1362_s13 = sshll.u32 (!%p242_p9), %s1833_s28, 2  ;;  %v285_v0 = vld [vmem:[%s2270_s1] sm:$0xff] (!%p242_p9)  ;;  %vm301_vm0 = vcmask (!%p242_p9), 261120   ;;  %v286_v7 = vld [vmem:[%s2270_s1 + $0x8] sm:$0xff] (!%p242_p9)  ;;  %v287_v8 = vld [vmem:[%s2270_s1 + $0x10] sm:$0xff] (!%p242_p9)  ;;  %vm431_vm1 = vcmask (!%p242_p9), 523264  }
   0xe   : > { %245 = sbr.rel (%p242_p9) target bundleno = 1546 (0x60a), region = 48  ;;  %p274_p10 = scmp.lt.s32.totalorder (!%p242_p9), %s1362_s13, 7  ;;  %1492 = vmatprep.mubr.msk.f32.mxu0 (!%p242_p9), %vm301_vm0, %v285_v0  ;;  %v288_v9 = vld [vmem:[%s2270_s1 + $0x18] sm:$0xff] (!%p242_p9)  ;;  %v289_v10 = vld [vmem:[%s2270_s1 + $0x20] sm:$0xff] (!%p242_p9)  ;;  %v290_v11 = vld [vmem:[%s2270_s1 + $0x28] sm:$0xff] (!%p242_p9)  ;;  %v1768_v51 = vmov (!%p242_p9), 0  }
   0xf   : > { %v291_v12 = vld [vmem:[%s2270_s1 + $0x30] sm:$0xff] (!%p242_p9)  ;;  %v292_v13 = vld [vmem:[%s2270_s1 + $0x38] sm:$0xff] (!%p242_p9)  ;;  %v293_v14 = vld [vmem:[%s2271_s2] sm:$0xff] (!%p242_p9)  ;;  %1667 = vset.pattern.permute.xlu1 (!%p242_p9), %v1768_v51  ;;  %1666 = vset.pattern.permute.xlu0 (!%p242_p9), %v1768_v51  ;;  %s1769_s8 = smov (!%p242_p9), [#allocation2]  }
  0x10   : > { %1520 = vmatprep.mubr.msk.f32.mxu1 (!%p242_p9), %vm431_vm1, %v293_v14  ;;  %v1927_v27 = vld [vmem:[%s2271_s2 + $0x8] sm:$0xff] (!%p242_p9)  ;;  %v1932_v28 = vld [vmem:[%s2271_s2 + $0x10] sm:$0xff] (!%p242_p9)  ;;  %v1941_v29 = vld [vmem:[%s2271_s2 + $0x18] sm:$0xff] (!%p242_p9)  ;;  %s1708_s9 = sshll.u32 (!%p242_p9), %s1769_s8, 4  ;;  %s1709_s9 = int_to_ptr.vmem [resolvable:$false] %s1708_s9 }
  0x11   : > { %v1946_v30 = vld [vmem:[%s2271_s2 + $0x20] sm:$0xff] (!%p242_p9)  ;;  %v1955_v31 = vld [vmem:[%s2271_s2 + $0x28] sm:$0xff] (!%p242_p9)  ;;  %v1960_v32 = vld [vmem:[%s2271_s2 + $0x30] sm:$0xff] (!%p242_p9) }
  0x12   : > { %v1969_v33 = vld [vmem:[%s2271_s2 + $0x38] sm:$0xff] (!%p242_p9)  ;;  %v755_v50 = vld [vmem:[%s2272_s3 + $0x8] sm:$0xff] (!%p242_p9)  ;;  %v810_v52 = vld [vmem:[%s2273_s4] sm:$0xff] (!%p242_p9) }
  0x13   : > { %v754_v53 = vld [vmem:[%s2272_s3] sm:$0xff] (!%p242_p9)  ;;  %v759_v54 = vld [vmem:[%s2272_s3 + $0x28] sm:$0xff] (!%p242_p9)  ;;  %v756_v57 = vld [vmem:[%s2272_s3 + $0x10] sm:$0xff] (!%p242_p9) }
  0x14   : > { %v811_v55 = vld [vmem:[%s2273_s4 + $0x8] sm:$0xff] (!%p242_p9)  ;;  %v761_v58 = vld [vmem:[%s2272_s3 + $0x38] sm:$0xff] (!%p242_p9)  ;;  %v812_v60 = vld [vmem:[%s2273_s4 + $0x10] sm:$0xff] (!%p242_p9) }
  0x15   : > { %s2284_s13 = smov (!%p274_p10, %s1362_s13), 7  ;;  %v815_v56 = vld [vmem:[%s2273_s4 + $0x28] sm:$0xff]  ;;  %v757_v59 = vld [vmem:[%s2272_s3 + $0x18] sm:$0xff]  ;;  %v758_v62 = vld [vmem:[%s2272_s3 + $0x20] sm:$0xff] }
  0x16   : > { %s1363_s16 = sshll.u32 %s2284_s13, 3  ;;  %v813_v61 = vld [vmem:[%s2273_s4 + $0x18] sm:$0xff]  ;;  %v814_v63 = vld [vmem:[%s2273_s4 + $0x20] sm:$0xff]  ;;  %v760_v0 = vld [vmem:[%s2272_s3 + $0x30] sm:$0xff]  ;;  %s1710_s13 = scalar_lea.vmem %s1709_s9, 8192 }
  0x17   : > { %s277_s19 = scalar_lea.vmem %s2269_s0, %s1363_s16  ;;  %s270_s16 = sand.u32 1, %s1758_s25  }
  0x18   : > { %v281_v1 = vld [vmem:[%s277_s19] sm:$0xff]  ;;  %v282_v2 = vld [vmem:[%s277_s19 + $0x8] sm:$0xff]  ;;  %v283_v3 = vld [vmem:[%s277_s19 + $0x10] sm:$0xff]  ;;  %s1361_s17 = sshll.u32 %s270_s16, 8 }
  0x19   : > { %v1584_v4 = vpack.c.bf16 %v282_v2, %v281_v1  ;;  %v284_v5 = vld [vmem:[%s277_s19 + $0x18] sm:$0xff]  ;;  %s2183_s18 = scalar_lea.vmem [#allocation2], %s1361_s17  ;;  %s1427_s19 = sshll.u32 %s1833_s28, 12 }
  0x1a   : > { %v1588_v6 = vpack.c.bf16 %v284_v5, %v283_v3  ;;  %s1295_s20 = sshll.u32 %s2183_s18, 4  ;;  %s2219_s23 = scalar_lea.hbm %s2276_s7, %s1427_s19  ;;  %s2221_s20 = int_to_ptr.vmem [resolvable:$true] %s1295_s20 }
  0x1b   : > { %1585 = vmatprep.subr.bf16.mxu0 %v1584_v4  ;;  %s2228_s28 = scalar_lea.sflag [#allocation3], %s270_s16  ;;  %s1704_s29 = scalar_lea.vmem %s2221_s20, 4096 }
  0x1c   : > { %1587 = vmatpush3.bf16.msra.mxu0 %v1584_v4  ;;  %p1705_p11 = scmp.ne.s32.totalorder %s2221_s20, %s1704_s29  ;;  %p1711_p0 = scmp.lt.s32.totalorder %s2221_s20, %s1709_s9 }
  0x1d   : > { %1589 = vmatprep.subr.bf16.mxu0 %v1588_v6  ;;  %p1712_p1 = scmp.lt.s32.totalorder %s1710_s13, %s1704_s29 }
  0x1e   : > { %p1706_p12 = pnand %p1705_p11, %p1850_p5 }
  0x1f   : > { %p1713_p2 = por %p1712_p1, %p1711_p0 }
  0x20   : > { %1591 = vmatpush3.bf16.msra.mxu0 %v1588_v6  ;;  %p1707_p13 = pneg %p1706_p12 }
  0x22   : > { %p1714_p3 = pnand %p1713_p2, %p1707_p13 }
  0x23   : > { %1493 = vmatmul.mubr.msk.f32.vlgmr.msra.gmra.mrb[0].mxu0 %vm301_vm0, %v286_v7 }
  0x24   : > { %1495 = vmatprep.mubr.msk.f32.mxu0 %vm301_vm0, %v287_v8 }
  0x27   : > { %1496 = vmatmul.mubr.msk.f32.gmra.mrb[2].mxu0 %vm301_vm0, %v288_v9 }
  0x28   : > { %1498 = vmatprep.mubr.msk.f32.mxu0 %vm301_vm0, %v289_v10 }
  0x2b   : > { %1499 = vmatmul.mubr.msk.f32.gmra.mrb[4].mxu0 %vm301_vm0, %v290_v11 }
  0x2c   : > { %1501 = vmatprep.mubr.msk.f32.mxu0 %vm301_vm0, %v291_v12 }
  0x2f   : > { %1502 = vmatmul.mubr.msk.f32.gmra.mrb[6].mxu0 %vm301_vm0, %v292_v13 }
  0x30   : > { %1167 = vmatprep.mubr.bf16.mxu0 %v1768_v51 }
  0xf6   : > { %v1900_v15 = vpop.f32.mrb[0].mxu0 }
  0xf7   : > { %v1902_v16 = vpop.f32.mrb[1].mxu0 }
  0xf8   : > { %v1592_v17 = vpack.c.bf16 %v1900_v15, %v1902_v16 }
  0xfa   : > { %v1906_v18 = vpop.f32.mrb[2].mxu0  ;;  %1593 = vmatprep.subr.bf16.mxu1 %v1592_v17 }
  0xfb   : > { %v1908_v19 = vpop.f32.mrb[3].mxu0  ;;  %1595 = vmatpush3.bf16.msra.mxu1 %v1592_v17 }
  0xfc   : > { %v1596_v20 = vpack.c.bf16 %v1906_v18, %v1908_v19 }
  0xfe   : > { %v1912_v21 = vpop.f32.mrb[4].mxu0  ;;  %1597 = vmatprep.subr.bf16.mxu1 %v1596_v20 }
  0xff   : > { %v1914_v22 = vpop.f32.mrb[5].mxu0  ;;  %1599 = vmatpush3.bf16.msra.mxu1 %v1596_v20 }
 0x100   : > { %v1600_v23 = vpack.c.bf16 %v1912_v21, %v1914_v22 }
 0x102   : > { %v1918_v24 = vpop.f32.mrb[6].mxu0  ;;  %1601 = vmatprep.subr.bf16.mxu1 %v1600_v23 }
 0x103   : > { %v1920_v25 = vpop.f32.mrb[7].mxu0  ;;  %1603 = vmatpush3.bf16.msra.mxu1 %v1600_v23 }
 0x104   : > { %v1604_v26 = vpack.c.bf16 %v1918_v24, %v1920_v25 }
 0x106   : > { %1605 = vmatprep.subr.bf16.mxu1 %v1604_v26 }
 0x107   : > { %1607 = vmatpush3.bf16.msra.mxu1 %v1604_v26 }
 0x10a   : > { %1521 = vmatmul.mubr.msk.f32.vlgmr.msra.gmra.mrb[0].mxu1 %vm431_vm1, %v1927_v27 }
 0x10b   : > { %1523 = vmatprep.mubr.msk.f32.mxu1 %vm431_vm1, %v1932_v28 }
 0x10e   : > { %1524 = vmatmul.mubr.msk.f32.gmra.mrb[2].mxu1 %vm431_vm1, %v1941_v29 }
 0x10f   : > { %1526 = vmatprep.mubr.msk.f32.mxu1 %vm431_vm1, %v1946_v30 }
 0x112   : > { %1527 = vmatmul.mubr.msk.f32.gmra.mrb[4].mxu1 %vm431_vm1, %v1955_v31 }
 0x113   : > { %1529 = vmatprep.mubr.msk.f32.mxu1 %vm431_vm1, %v1960_v32 }
 0x116   : > { %1530 = vmatmul.mubr.msk.f32.gmra.mrb[6].mxu1 %vm431_vm1, %v1969_v33 }
 0x117   : > { %1548 = vmatprep.mubr.msk.f32.mxu1 %vm431_vm1, %v293_v14 }
 0x1dd   : > { %v1522_v34 = vpop.f32.mrb[0].mxu1 }
 0x1de   : > { %v522_v35 = vpop.f32.mrb[1].mxu1  ;;  %v564_v40 = vsel %vm431_vm1, %v1522_v34, 0.0 }
 0x1df   : > { %v561_v36 = vsel %vm431_vm1, %v522_v35, 0.0 }
 0x1e0   : > { %562 = vadd.xlane.f32.xlu0 %v561_v36 }
 0x1e1   : > { %v1525_v37 = vpop.f32.mrb[2].mxu1 }
 0x1e2   : > { %v532_v38 = vpop.f32.mrb[3].mxu1  ;;  %v570_v39 = vsel %vm431_vm1, %v1525_v37, 0.0 }
 0x1e3   : > { %571 = vadd.xlane.f32.xlu1 %v570_v39  ;;  %v567_v43 = vsel %vm431_vm1, %v532_v38, 0.0 }
 0x1e4   : > { %565 = vadd.xlane.f32.xlu0 %v564_v40 }
 0x1e5   : > { %v1528_v41 = vpop.f32.mrb[4].mxu1 }
 0x1e6   : > { %v542_v42 = vpop.f32.mrb[5].mxu1  ;;  %v576_v45 = vsel %vm431_vm1, %v1528_v41, 0.0 }
 0x1e7   : > { %568 = vadd.xlane.f32.xlu1 %v567_v43  ;;  %v573_v44 = vsel %vm431_vm1, %v542_v42, 0.0 }
 0x1e8   : > { %574 = vadd.xlane.f32.xlu0 %v573_v44 }
 0x1e9   : > { %v1531_v46 = vpop.f32.mrb[6].mxu1 }
 0x1ea   : > { %v552_v47 = vpop.f32.mrb[7].mxu1  ;;  %v582_v49 = vsel %vm431_vm1, %v1531_v46, 0.0  ;;  %v817_v46 = vld [vmem:[%s2273_s4 + $0x38] sm:$0xff] }
 0x1eb   : > { %577 = vadd.xlane.f32.xlu1 %v576_v45  ;;  %v579_v48 = vsel %vm431_vm1, %v552_v47, 0.0  ;;  %v816_v45 = vld [vmem:[%s2273_s4 + $0x30] sm:$0xff]  ;;  %v1668_v47 = vld [vmem:[%s2274_s5] sm:$0xff]  }
 0x1ec   : > { %580 = vadd.xlane.f32.xlu0 %v579_v48  ;;  %v1676_v48 = vld [vmem:[%s2275_s6] ss:$8 sps:$4 sm:$0xff]  }
 0x1ef   : > { %583 = vadd.xlane.f32.xlu1 %v582_v49  ;;  %v1678_v49 = vld [vmem:[%s2275_s6 + $0x4] ss:$8 sps:$4 sm:$0xff]  }
 0x1f0   : > { %1135 = vmatprep.subr.bf16.mxu0 %v1678_v49 }
 0x1f1   : > { %1136 = vmatpush1.bf16.msra.mxu0 %v1676_v48 }
 0x200   : > { %769 = vperm.xlu1 %1667, %v755_v50   ;;  %v1681_v50 = vld [vmem:[%s2275_s6 + $0x14] ss:$8 sps:$4 sm:$0xff]  }
 0x201   : > { %1137 = vmatprep.subr.bf16.mxu0 %v1681_v50 }
 0x202   : > { %764 = vperm.xlu0 %1666, %v754_v53   ;;  %v1684_v53 = vld [vmem:[%s2275_s6 + $0x24] ss:$8 sps:$4 sm:$0xff]  }
 0x204   : > { %820 = vperm.xlu1 %1667, %v810_v52   ;;  %v1679_v52 = vld [vmem:[%s2275_s6 + $0x10] ss:$8 sps:$4 sm:$0xff]  }
 0x205   : > { %1138 = vmatpush1.bf16.msra.mxu0 %v1679_v52 }
 0x206   : > { %789 = vperm.xlu0 %1666, %v759_v54   ;;  %1139 = vmatprep.subr.bf16.mxu0 %v1684_v53 }
 0x208   : > { %825 = vperm.xlu1 %1667, %v811_v55   ;;  %v1682_v55 = vld [vmem:[%s2275_s6 + $0x20] ss:$8 sps:$4 sm:$0xff]  }
 0x209   : > { %1140 = vmatpush1.bf16.msra.mxu0 %v1682_v55 }
 0x20a   : > { %845 = vperm.xlu0 %1666, %v815_v56  }
 0x20c   : > { %774 = vperm.xlu1 %1667, %v756_v57  }
 0x20e   : > { %799 = vperm.xlu0 %1666, %v761_v58  }
 0x210   : > { %779 = vperm.xlu1 %1667, %v757_v59  }
 0x214   : > { %830 = vperm.xlu1 %1667, %v812_v60  }
 0x218   : > { %835 = vperm.xlu1 %1667, %v813_v61  }
 0x21c   : > { %784 = vperm.xlu1 %1667, %v758_v62  }
 0x220   : > { %840 = vperm.xlu1 %1667, %v814_v63  }
 0x224   : > { %794 = vperm.xlu1 %1667, %v760_v0  }
 0x26d   : > { %v563_v1 = vpop.xlane.xlu0 %562 }
 0x26e   : > { %v2028_v2 = vsub.f32 %v1902_v16, %v563_v1 }
 0x270   : > { %v572_v3 = vpop.xlane.xlu1 %571  ;;  %v593_v7 = vmul.f32 %v2028_v2, %v2028_v2 }
 0x271   : > { %v566_v4 = vpop.xlane.xlu0 %565  ;;  %v2034_v6 = vsub.f32 %v1906_v18, %v572_v3 }
 0x272   : > { %v2031_v5 = vsub.f32 %v1900_v15, %v566_v4 }
 0x273   : > { %v596_v13 = vmul.f32 %v2034_v6, %v2034_v6 }
 0x274   : > { %v594_v8 = vmul.f32 %v2031_v5, %v2031_v5  ;;  %v569_v9 = vpop.xlane.xlu1 %568 }
 0x275   : > { %v2041_v10 = vsub.f32 %v1908_v19, %v569_v9  ;;  %v575_v11 = vpop.xlane.xlu0 %574 }
 0x276   : > { %v1608_v12 = vpack.c.bf16 %v594_v8, %v593_v7  ;;  %v2048_v15 = vsub.f32 %v1914_v22, %v575_v11 }
 0x277   : > { %v595_v14 = vmul.f32 %v2041_v10, %v2041_v10 }
 0x278   : > { %1609 = vmatprep.subr.bf16.mxu1 %v1608_v12  ;;  %v578_v16 = vpop.xlane.xlu1 %577  ;;  %v597_v20 = vmul.f32 %v2048_v15, %v2048_v15 }
 0x279   : > { %v2051_v17 = vsub.f32 %v1912_v21, %v578_v16  ;;  %1611 = vmatpush3.bf16.msra.mxu1 %v1608_v12  ;;  %v581_v18 = vpop.xlane.xlu0 %580  ;;  %v1612_v19 = vpack.c.bf16 %v596_v13, %v595_v14 }
 0x27a   : > { %v2058_v26 = vsub.f32 %v1920_v25, %v581_v18 }
 0x27b   : > { %v598_v23 = vmul.f32 %v2051_v17, %v2051_v17  ;;  %1613 = vmatprep.subr.bf16.mxu1 %v1612_v19 }
 0x27c   : > { %v584_v22 = vpop.xlane.xlu1 %583  ;;  %v599_v35 = vmul.f32 %v2058_v26, %v2058_v26 }
 0x27d   : > { %v2061_v34 = vsub.f32 %v1918_v24, %v584_v22  ;;  %1615 = vmatpush3.bf16.msra.mxu1 %v1612_v19  ;;  %v1616_v21 = vpack.c.bf16 %v598_v23, %v597_v20 }
 0x27f   : > { %v600_v36 = vmul.f32 %v2061_v34, %v2061_v34  ;;  %1617 = vmatprep.subr.bf16.mxu1 %v1616_v21 }
 0x280   : > { %v770_v54 = vpop.permute.xlu1 %769 }
 0x281   : > { %1619 = vmatpush3.bf16.msra.mxu1 %v1616_v21  ;;  %v1620_v37 = vpack.c.bf16 %v600_v36, %v599_v35  ;;  %v765_v62 = vpop.permute.xlu0 %764 }
 0x283   : > { %1621 = vmatprep.subr.bf16.mxu1 %v1620_v37 }
 0x284   : > { %v821_v56 = vpop.permute.xlu1 %820 }
 0x285   : > { %1623 = vmatpush3.bf16.msra.mxu1 %v1620_v37  ;;  %v790_v0 = vpop.permute.xlu0 %789 }
 0x288   : > { %1549 = vmatmul.mubr.msk.f32.vlgmr.msra.gmra.mrb[8].mxu1 %vm431_vm1, %v1927_v27  ;;  %v826_v57 = vpop.permute.xlu1 %825 }
 0x289   : > { %1551 = vmatprep.mubr.msk.f32.mxu1 %vm431_vm1, %v1932_v28  ;;  %v846_v3 = vpop.permute.xlu0 %845 }
 0x28c   : > { %1552 = vmatmul.mubr.msk.f32.gmra.mrb[10].mxu1 %vm431_vm1, %v1941_v29  ;;  %v775_v58 = vpop.permute.xlu1 %774 }
 0x28d   : > { %1554 = vmatprep.mubr.msk.f32.mxu1 %vm431_vm1, %v1946_v30  ;;  %v800_v7 = vpop.permute.xlu0 %799 }
 0x290   : > { %1555 = vmatmul.mubr.msk.f32.gmra.mrb[12].mxu1 %vm431_vm1, %v1955_v31  ;;  %v780_v59 = vpop.permute.xlu1 %779 }
 0x291   : > { %1557 = vmatprep.mubr.msk.f32.mxu1 %vm431_vm1, %v1960_v32 }
 0x294   : > { %1558 = vmatmul.mubr.msk.f32.gmra.mrb[14].mxu1 %vm431_vm1, %v1969_v33  ;;  %v831_v60 = vpop.permute.xlu1 %830 }
 0x295   : > { %1568 = vmatprep.mubr.msk.bf16.mxu1 %vm431_vm1, %v1668_v47 }
 0x298   : > { %v836_v61 = vpop.permute.xlu1 %835 }
 0x29c   : > { %v785_v63 = vpop.permute.xlu1 %784 }
 0x2a0   : > { %v2117_v1 = vpop.permute.xlu1 %840 }
 0x2a4   : > { %v2119_v4 = vpop.permute.xlu1 %794 }
 0x35b   : > { %v1550_v24 = vpop.f32.mrb[8].mxu1 }
 0x35c   : > { %v667_v25 = vpop.f32.mrb[9].mxu1  ;;  %v709_v27 = vsel %vm431_vm1, %v1550_v24, 0.0 }
 0x35d   : > { %710 = vadd.xlane.f32.xlu1 %v709_v27  ;;  %v706_v28 = vsel %vm431_vm1, %v667_v25, 0.0 }
 0x35e   : > { %707 = vadd.xlane.f32.xlu0 %v706_v28 }
 0x35f   : > { %v1553_v29 = vpop.f32.mrb[10].mxu1 }
 0x360   : > { %v677_v38 = vpop.f32.mrb[11].mxu1  ;;  %v715_v30 = vsel %vm431_vm1, %v1553_v29, 0.0 }
 0x361   : > { %716 = vadd.xlane.f32.xlu1 %v715_v30  ;;  %v712_v31 = vsel %vm431_vm1, %v677_v38, 0.0 }
 0x362   : > { %713 = vadd.xlane.f32.xlu0 %v712_v31 }
 0x363   : > { %v1556_v32 = vpop.f32.mrb[12].mxu1 }
 0x364   : > { %v687_v39 = vpop.f32.mrb[13].mxu1  ;;  %v721_v33 = vsel %vm431_vm1, %v1556_v32, 0.0 }
 0x365   : > { %722 = vadd.xlane.f32.xlu1 %v721_v33  ;;  %v718_v40 = vsel %vm431_vm1, %v687_v39, 0.0 }
 0x366   : > { %719 = vadd.xlane.f32.xlu0 %v718_v40 }
 0x367   : > { %v1559_v41 = vpop.f32.mrb[14].mxu1 }
 0x368   : > { %v697_v42 = vpop.f32.mrb[15].mxu1  ;;  %v727_v43 = vsel %vm431_vm1, %v1559_v41, 0.0 }
 0x369   : > { %728 = vadd.xlane.f32.xlu1 %v727_v43  ;;  %v724_v44 = vsel %vm431_vm1, %v697_v42, 0.0 }
 0x36a   : > { %725 = vadd.xlane.f32.xlu0 %v724_v44 }
 0x37a   : > { %850 = vperm.xlu1 %1667, %v816_v45  }
 0x380   : > { %855 = vperm.xlu0 %1666, %v817_v46  }
 0x3ea   : > { %v711_v8 = vpop.xlane.xlu1 %710 }
 0x3eb   : > { %v731_v9 = vadd.f32 1e-05, %v711_v8  ;;  %v708_v11 = vpop.xlane.xlu0 %707 }
 0x3ec   : > { %v730_v12 = vadd.f32 1e-05, %v708_v11 }
 0x3ed   : > { %1688 = vrsqrt.f32 %v731_v9 }
 0x3ee   : > { %1690 = vrsqrt.f32 %v730_v12  ;;  %v717_v13 = vpop.xlane.xlu1 %716  ;;  %v1673_v12 = vld [vmem:[%s2274_s5 + $0x28] sm:$0xff]  }
 0x3ef   : > { %v733_v14 = vadd.f32 1e-05, %v717_v13  ;;  %v714_v16 = vpop.xlane.xlu0 %713  ;;  %v1674_v13 = vld [vmem:[%s2274_s5 + $0x30] sm:$0xff]  }
 0x3f0   : > { %v732_v18 = vadd.f32 1e-05, %v714_v16  ;;  %v1687_v16 = vld [vmem:[%s2275_s6 + $0x34] ss:$8 sps:$4 sm:$0xff]  }
 0x3f1   : > { %1692 = vrsqrt.f32 %v733_v14  ;;  %v1675_v14 = vld [vmem:[%s2274_s5 + $0x38] sm:$0xff]   ;;  %1141 = vmatprep.subr.bf16.mxu0 %v1687_v16 }
 0x3f2   : > { %1694 = vrsqrt.f32 %v732_v18  ;;  %v723_v19 = vpop.xlane.xlu1 %722  ;;  %v1685_v18 = vld [vmem:[%s2275_s6 + $0x30] ss:$8 sps:$4 sm:$0xff]  }
 0x3f3   : > { %v735_v20 = vadd.f32 1e-05, %v723_v19  ;;  %v720_v23 = vpop.xlane.xlu0 %719  ;;  %1142 = vmatpush1.bf16.msra.mxu0 %v1685_v18 }
 0x3f4   : > { %v734_v22 = vadd.f32 1e-05, %v720_v23 }
 0x3f5   : > { %1696 = vrsqrt.f32 %v735_v20 }
 0x3f6   : > { %1698 = vrsqrt.f32 %v734_v22  ;;  %v729_v21 = vpop.xlane.xlu1 %728 }
 0x3f7   : > { %v1689_v35 = vpop.eup %1688  ;;  %v737_v36 = vadd.f32 1e-05, %v729_v21  ;;  %v726_v37 = vpop.xlane.xlu0 %725 }
 0x3f8   : > { %v1691_v24 = vpop.eup %1690  ;;  %v736_v25 = vadd.f32 1e-05, %v726_v37  ;;  %v747_v27 = vmul.f32 %v1689_v35, %v2031_v5 }
 0x3f9   : > { %1700 = vrsqrt.f32 %v737_v36  ;;  %v746_v28 = vmul.f32 %v1691_v24, %v2028_v2 }
 0x3fa   : > { %1702 = vrsqrt.f32 %v736_v25  ;;  %v803_v29 = vmul.f32 %v770_v54, %v747_v27 }
 0x3fb   : > { %v1693_v38 = vpop.eup %1692  ;;  %v802_v30 = vmul.f32 %v765_v62, %v746_v28 }
 0x3fc   : > { %v1695_v31 = vpop.eup %1694  ;;  %v859_v32 = vadd.f32 %v826_v57, %v803_v29  ;;  %v749_v39 = vmul.f32 %v1693_v38, %v2034_v6 }
 0x3fd   : > { %v858_v33 = vadd.f32 %v821_v56, %v802_v30  ;;  %v748_v40 = vmul.f32 %v1695_v31, %v2041_v10 }
 0x3fe   : > { %v867_v41 = vmax.f32 %v859_v32, 0.0  ;;  %v805_v42 = vmul.f32 %v780_v59, %v749_v39 }
 0x3ff   : > { %v1697_v43 = vpop.eup %1696  ;;  %v866_v44 = vmax.f32 %v858_v33, 0.0  ;;  %v804_v45 = vmul.f32 %v775_v58, %v748_v40 }
 0x400   : > { %v1699_v5 = vpop.eup %1698  ;;  %v861_v46 = vadd.f32 %v836_v61, %v805_v42  ;;  %v751_v2 = vmul.f32 %v1697_v43, %v2051_v17  ;;  %v856_v61 = vpop.permute.xlu0 %855 }
 0x401   : > { %v890_v47 = vpack.c.bf16 %v867_v41, %v866_v44  ;;  %v860_v48 = vadd.f32 %v831_v60, %v804_v45  ;;  %v750_v49 = vmul.f32 %v1699_v5, %v2048_v15 }
 0x402   : > { %v869_v50 = vmax.f32 %v861_v46, 0.0  ;;  %v807_v52 = vmul.f32 %v790_v0, %v751_v2  ;;  %v851_v0 = vpop.permute.xlu1 %850 }
 0x403   : > { %v1701_v53 = vpop.eup %1700  ;;  %1560 = vmatprep.subr.bf16.mxu1 %v890_v47  ;;  %v868_v6 = vmax.f32 %v860_v48, 0.0  ;;  %v806_v54 = vmul.f32 %v785_v63, %v750_v49 }
 0x404   : > { %v1703_v10 = vpop.eup %1702  ;;  %v753_v55 = vmul.f32 %v1701_v53, %v2061_v34  ;;  %1561 = vmatpush3.bf16.msra.mxu1 %v890_v47  ;;  %v863_v56 = vadd.f32 %v846_v3, %v807_v52  ;;  %v1670_v3 = vld [vmem:[%s2274_s5 + $0x10] sm:$0xff]  }
 0x405   : > { %v752_v57 = vmul.f32 %v1703_v10, %v2058_v26  ;;  %v891_v58 = vpack.c.bf16 %v869_v50, %v868_v6  ;;  %v862_v17 = vadd.f32 %v2117_v1, %v806_v54  ;;  %v1669_v1 = vld [vmem:[%s2274_s5 + $0x8] sm:$0xff]  }
 0x406   : > { %v809_v59 = vmul.f32 %v800_v7, %v753_v55  ;;  %v871_v60 = vmax.f32 %v863_v56, 0.0  ;;  %v1672_v7 = vld [vmem:[%s2274_s5 + $0x20] sm:$0xff]  }
 0x407   : > { %v808_v15 = vmul.f32 %v2119_v4, %v752_v57  ;;  %1562 = vmatprep.subr.bf16.mxu1 %v891_v58  ;;  %v870_v62 = vmax.f32 %v862_v17, 0.0  ;;  %v1671_v4 = vld [vmem:[%s2274_s5 + $0x18] sm:$0xff]  }
 0x408   : > { %v865_v8 = vadd.f32 %v856_v61, %v809_v59  ;;  %1563 = vmatpush3.bf16.msra.mxu1 %v891_v58 }
 0x409   : > { %v864_v63 = vadd.f32 %v851_v0, %v808_v15  ;;  %v892_v9 = vpack.c.bf16 %v871_v60, %v870_v62 }
 0x40a   : > { %v873_v34 = vmax.f32 %v865_v8, 0.0 }
 0x40b   : > { %v872_v11 = vmax.f32 %v864_v63, 0.0  ;;  %1564 = vmatprep.subr.bf16.mxu1 %v892_v9 }
 0x40c   : > { %1565 = vmatpush3.bf16.msra.mxu1 %v892_v9 }
 0x40d   : > { %v893_v26 = vpack.c.bf16 %v873_v34, %v872_v11 }
 0x40f   : > { %1566 = vmatprep.subr.bf16.mxu1 %v893_v26 }
 0x410   : > { %1567 = vmatpush3.bf16.msra.mxu1 %v893_v26 }
 0x413   : > { %1569 = vmatmul.mubr.msk.bf16.vlgmr.msra.gmra.mrb[16].mxu1 %vm431_vm1, %v1669_v1 }
 0x414   : > { %1572 = vmatprep.mubr.msk.bf16.mxu1 %vm431_vm1, %v1670_v3 }
 0x41b   : > { %1573 = vmatmul.mubr.msk.bf16.gmra.mrb[20].mxu1 %vm431_vm1, %v1671_v4 }
 0x41c   : > { %1576 = vmatprep.mubr.msk.bf16.mxu1 %vm431_vm1, %v1672_v7 }
 0x423   : > { %1577 = vmatmul.mubr.msk.bf16.gmra.mrb[24].mxu1 %vm431_vm1, %v1673_v12 }
 0x424   : > { %1580 = vmatprep.mubr.msk.bf16.mxu1 %vm431_vm1, %v1674_v13 }
 0x42b   : > { %1581 = vmatmul.mubr.msk.bf16.gmra.mrb[28].mxu1 %vm431_vm1, %v1675_v14 }
 0x4e6   : > { %v1570_v19 = vpop.f32.mrb[16].mxu1 }
 0x4e7   : > { %v992_v20 = vpop.f32.mrb[17].mxu1 }
 0x4e8   : > { %v1571_v23 = vpop.f32.mrb[18].mxu1 }
 0x4e9   : > { %v1056_v22 = vpack.c.bf16 %v1571_v23, %v1570_v19  ;;  %v995_v21 = vpop.f32.mrb[19].mxu1 }
 0x4ea   : > { %v1055_v35 = vpack.c.bf16 %v995_v21, %v992_v20 }
 0x4ec   : > { %1412 = vmatmul.mubr.msk.bf16.vlgmr.msra.gmra.mrb[8].mxu0 %vm431_vm1, %v1055_v35 }
 0x4ed   : > { %1177 = vmatprep.mubr.bf16.mxu0 %v1768_v51 }
 0x4ee   : > { %v1574_v36 = vpop.f32.mrb[20].mxu1 }
 0x4ef   : > { %v1008_v37 = vpop.f32.mrb[21].mxu1 }
 0x4f0   : > { %v1575_v24 = vpop.f32.mrb[22].mxu1 }
 0x4f1   : > { %v1058_v25 = vpack.c.bf16 %v1575_v24, %v1574_v36  ;;  %v1011_v27 = vpop.f32.mrb[23].mxu1 }
 0x4f2   : > { %v1057_v28 = vpack.c.bf16 %v1011_v27, %v1008_v37 }
 0x4f4   : > { %1413 = vmatmul.mubr.msk.bf16.gmra.mrb[12].mxu0 %vm431_vm1, %v1056_v22 }
 0x4f5   : > { %1187 = vmatprep.mubr.bf16.mxu0 %v1768_v51 }
 0x4f6   : > { %v1578_v29 = vpop.f32.mrb[24].mxu1 }
 0x4f7   : > { %v1024_v38 = vpop.f32.mrb[25].mxu1 }
 0x4f8   : > { %v1579_v30 = vpop.f32.mrb[26].mxu1 }
 0x4f9   : > { %v1060_v31 = vpack.c.bf16 %v1579_v30, %v1578_v29  ;;  %v1027_v32 = vpop.f32.mrb[27].mxu1 }
 0x4fa   : > { %v1059_v39 = vpack.c.bf16 %v1027_v32, %v1024_v38 }
 0x4fc   : > { %1414 = vmatmul.mubr.msk.bf16.gmra.mrb[16].mxu0 %vm431_vm1, %v1057_v28 }
 0x4fd   : > { %1197 = vmatprep.mubr.bf16.mxu0 %v1768_v51 }
 0x4fe   : > { %v1582_v33 = vpop.f32.mrb[28].mxu1 }
 0x4ff   : > { %v1040_v40 = vpop.f32.mrb[29].mxu1 }
 0x500   : > { %v1583_v41 = vpop.f32.mrb[30].mxu1 }
 0x501   : > { %v1062_v42 = vpack.c.bf16 %v1583_v41, %v1582_v33  ;;  %v1043_v43 = vpop.f32.mrb[31].mxu1 }
 0x502   : > { %v1061_v44 = vpack.c.bf16 %v1043_v43, %v1040_v40 }
 0x504   : > { %1415 = vmatmul.mubr.msk.bf16.gmra.mrb[20].mxu0 %vm431_vm1, %v1058_v25 }
 0x505   : > { %1207 = vmatprep.mubr.bf16.mxu0 %v1768_v51 }
 0x50c   : > { %1416 = vmatmul.mubr.msk.bf16.gmra.mrb[24].mxu0 %vm431_vm1, %v1059_v39 }
 0x50d   : > { %1217 = vmatprep.mubr.bf16.mxu0 %v1768_v51 }
 0x514   : > { %1417 = vmatmul.mubr.msk.bf16.gmra.mrb[28].mxu0 %vm431_vm1, %v1060_v31 }
 0x515   : > { %1227 = vmatprep.mubr.bf16.mxu0 %v1768_v51 }
 0x51c   : > { %1418 = vmatmul.mubr.msk.bf16.gmra.mrb[32].mxu0 %vm431_vm1, %v1061_v44 }
 0x51d   : > { %1237 = vmatprep.mubr.bf16.mxu0 %v1768_v51 }
 0x524   : > { %1419 = vmatmul.mubr.msk.bf16.gmra.mrb[36].mxu0 %vm431_vm1, %v1062_v42 }
 0x5bf   : > { %v1169_v45 = vpop.f32.mrb[8].mxu0 }
 0x5c0   : > { %1248 = vst [vmem:[%s2183_s18] sm:$0xff] %v1169_v45  ;;  %v1171_v5 = vpop.f32.mrb[9].mxu0 }
 0x5c1   : > { %1249 = vst [vmem:[%s2183_s18 + $0x8] sm:$0xff] %v1171_v5  ;;  %v1173_v51 = vpop.f32.mrb[10].mxu0 }
 0x5c2   : > { %1250 = vst [vmem:[%s2183_s18 + $0x10] sm:$0xff] %v1173_v51  ;;  %v1175_v46 = vpop.f32.mrb[11].mxu0 }
 0x5c3   : > { %1251 = vst [vmem:[%s2183_s18 + $0x18] sm:$0xff] %v1175_v46 }
 0x5c7   : > { %v1179_v2 = vpop.f32.mrb[12].mxu0 }
 0x5c8   : > { %1252 = vst [vmem:[%s2183_s18 + $0x20] sm:$0xff] %v1179_v2  ;;  %v1181_v47 = vpop.f32.mrb[13].mxu0 }
 0x5c9   : > { %1253 = vst [vmem:[%s2183_s18 + $0x28] sm:$0xff] %v1181_v47  ;;  %v1183_v48 = vpop.f32.mrb[14].mxu0 }
 0x5ca   : > { %1254 = vst [vmem:[%s2183_s18 + $0x30] sm:$0xff] %v1183_v48  ;;  %v1185_v49 = vpop.f32.mrb[15].mxu0 }
 0x5cb   : > { %1255 = vst [vmem:[%s2183_s18 + $0x38] sm:$0xff] %v1185_v49 }
 0x5cf   : > { %v1189_v50 = vpop.f32.mrb[16].mxu0 }
 0x5d0   : > { %1256 = vst [vmem:[%s2183_s18 + $0x40] sm:$0xff] %v1189_v50  ;;  %v1191_v52 = vpop.f32.mrb[17].mxu0 }
 0x5d1   : > { %1257 = vst [vmem:[%s2183_s18 + $0x48] sm:$0xff] %v1191_v52  ;;  %v1193_v53 = vpop.f32.mrb[18].mxu0 }
 0x5d2   : > { %1258 = vst [vmem:[%s2183_s18 + $0x50] sm:$0xff] %v1193_v53  ;;  %v1195_v6 = vpop.f32.mrb[19].mxu0 }
 0x5d3   : > { %1259 = vst [vmem:[%s2183_s18 + $0x58] sm:$0xff] %v1195_v6 }
 0x5d7   : > { %v1199_v54 = vpop.f32.mrb[20].mxu0 }
 0x5d8   : > { %1260 = vst [vmem:[%s2183_s18 + $0x60] sm:$0xff] %v1199_v54  ;;  %v1201_v10 = vpop.f32.mrb[21].mxu0 }
 0x5d9   : > { %1261 = vst [vmem:[%s2183_s18 + $0x68] sm:$0xff] %v1201_v10  ;;  %v1203_v55 = vpop.f32.mrb[22].mxu0 }
 0x5da   : > { %1262 = vst [vmem:[%s2183_s18 + $0x70] sm:$0xff] %v1203_v55  ;;  %v1205_v56 = vpop.f32.mrb[23].mxu0 }
 0x5db   : > { %1263 = vst [vmem:[%s2183_s18 + $0x78] sm:$0xff] %v1205_v56 }
 0x5df   : > { %v1209_v57 = vpop.f32.mrb[24].mxu0 }
 0x5e0   : > { %1264 = vst [vmem:[%s2183_s18 + $0x80] sm:$0xff] %v1209_v57  ;;  %v1211_v58 = vpop.f32.mrb[25].mxu0 }
 0x5e1   : > { %1265 = vst [vmem:[%s2183_s18 + $0x88] sm:$0xff] %v1211_v58  ;;  %v1213_v17 = vpop.f32.mrb[26].mxu0 }
 0x5e2   : > { %1266 = vst [vmem:[%s2183_s18 + $0x90] sm:$0xff] %v1213_v17  ;;  %v1215_v59 = vpop.f32.mrb[27].mxu0 }
 0x5e3   : > { %1267 = vst [vmem:[%s2183_s18 + $0x98] sm:$0xff] %v1215_v59 }
 0x5e7   : > { %v1219_v60 = vpop.f32.mrb[28].mxu0 }
 0x5e8   : > { %1268 = vst [vmem:[%s2183_s18 + $0xa0] sm:$0xff] %v1219_v60  ;;  %v1221_v15 = vpop.f32.mrb[29].mxu0 }
 0x5e9   : > { %1269 = vst [vmem:[%s2183_s18 + $0xa8] sm:$0xff] %v1221_v15  ;;  %v1223_v61 = vpop.f32.mrb[30].mxu0 }
 0x5ea   : > { %1270 = vst [vmem:[%s2183_s18 + $0xb0] sm:$0xff] %v1223_v61  ;;  %v1225_v62 = vpop.f32.mrb[31].mxu0 }
 0x5eb   : > { %1271 = vst [vmem:[%s2183_s18 + $0xb8] sm:$0xff] %v1225_v62 }
 0x5ef   : > { %v1229_v0 = vpop.f32.mrb[32].mxu0 }
 0x5f0   : > { %1272 = vst [vmem:[%s2183_s18 + $0xc0] sm:$0xff] %v1229_v0  ;;  %v1231_v8 = vpop.f32.mrb[33].mxu0 }
 0x5f1   : > { %1273 = vst [vmem:[%s2183_s18 + $0xc8] sm:$0xff] %v1231_v8  ;;  %v1233_v63 = vpop.f32.mrb[34].mxu0 }
 0x5f2   : > { %1274 = vst [vmem:[%s2183_s18 + $0xd0] sm:$0xff] %v1233_v63  ;;  %v1235_v9 = vpop.f32.mrb[35].mxu0 }
 0x5f3   : > { %1275 = vst [vmem:[%s2183_s18 + $0xd8] sm:$0xff] %v1235_v9 }
 0x5f7   : > { %v1239_v34 = vpop.f32.mrb[36].mxu0 }
 0x5f8   : > { %1276 = vst [vmem:[%s2183_s18 + $0xe0] sm:$0xff] %v1239_v34  ;;  %v1241_v11 = vpop.f32.mrb[37].mxu0 }
 0x5f9   : > { %1277 = vst [vmem:[%s2183_s18 + $0xe8] sm:$0xff] %v1241_v11  ;;  %v1243_v26 = vpop.f32.mrb[38].mxu0 }
 0x5fa   : > { %1278 = vst [vmem:[%s2183_s18 + $0xf0] sm:$0xff] %v1243_v26  ;;  %v1245_v1 = vpop.f32.mrb[39].mxu0 }
 0x5fb   : > { %1279 = vst [vmem:[%s2183_s18 + $0xf8] sm:$0xff] %v1245_v1 }
 0x5fc   : > { %1717 = shalt.err (!%p1714_p3)
}
 0x5fd   : > { %s1718_s14 = scalar_lea.hbm %s2219_s23, 4096  ;;  %s1722_s17 = scalar_lea.hbm %s2276_s7, 8192 }
 0x5fe   : > { %p1719_p4 = scmp.ne.s32.totalorder %s2219_s23, %s1718_s14  ;;  %p1723_p9 = scmp.lt.u32.totalorder %s2219_s23, %s2276_s7 }
 0x5ff   : > { %p1724_p10 = scmp.lt.u32.totalorder %s1722_s17, %s1718_s14  ;;  %p1726_p12 = scmp.lt.u32.totalorder %s1718_s14, %s2219_s23 }
 0x600   : > { %p1720_p7 = pnand %p1719_p4, %p1850_p5 }
 0x601   : > { %p1725_p11 = por %p1724_p10, %p1723_p9 }
 0x602   : > { %p1721_p8 = pneg %p1720_p7 }
 0x603   : > { %p1727_p13 = por %p1726_p12, %p1725_p11 }
 0x605   : > { %p1728_p0 = pnand %p1727_p13, %p1721_p8 }
 0x607   : > { %1731 = shalt.err (!%p1728_p0)
}
 0x608   : > { %s1770_s21 = smov 256   ;;  %s1771_s22 = smov 16  }
 0x609   : > { %1624 = dma.vmem_to_hbm [thread:$0]  (%p1850_p5), %s2221_s20, 4096, %s2219_s23, %s2228_s28, %s1770_s21, %s1770_s21, %s1771_s22  }
 0x60a PF: > { %p1630_p1 = scmp.ge.s32.totalorder %s1766_s27, 2  ;;  %s1310_s29 = sand.u32 1, %s1754_s24  }
 0x60b   : > { %s1311_s8 = scalar_lea.sflag [#allocation3], %s1310_s29 }
 0x60c   : > { %p1627_p2 = pnand %p1630_p1, %p1854_p6 }
 0x60e   : > { %1749 = dma.done.wait (!%p1627_p2), %s1311_s8, 4096  }
 0x60f   : > { %1751 = vsyncadd (!%p1627_p2), %s1311_s8, 4294963200  ;;  %p17_p3 = scmp.ge.s32.totalorder %s1837_s30, 4   ;;  %s2279_s24 = smov %s1758_s25 }
 0x610   : > { %s2280_s25 = smov %s1762_s26  ;;  %s2281_s26 = smov %s1848_s10 }
 0x611   : > { %s2282_s27 = smov %s1837_s30  ;;  %19 = sbr.rel (!%p17_p3) target bundleno = 3 (0x3), region = 83 }
 0x618   :  { %1316 = vsyncpa [#allocation3], 1 }
 0x619   :  { %1318 = vsyncpa [#allocation3 + $0x1], 1 }

</bundles_post_ra>
